<compile_context>
chip_gen: v7x
topology: tpu7x:2x2x1
jax: 0.10.0
libtpu: 0.0.40
codegen_flags: <defaults>
</compile_context>

<pallas_src>
import math

import jax
import jax.numpy as jnp
from jax.experimental import pallas as pl
from jax.experimental.pallas import tpu as pltpu

SEQ = 128         # small sequence length (rows of x)
DIM = 128         # input_dim from the module (default 128)


def attention_kernel(x_ref, wqkv_ref, wo_ref, bo_ref, o_ref):
    # x arrives f32 (matches module input); cast once to bf16 for the MXU.
    x = x_ref[...].astype(jnp.bfloat16)                          # (SEQ, DIM)

    # Fused Q/K/V projection: one (SEQ,128) @ (128,384) bf16 matmul, f32 acc.
    # The 1/sqrt(d_k) scale is already folded into the Wq block of wqkv; the
    # value bias is folded into bo (see wrapper), so no bias add here.
    qkv = jnp.dot(x, wqkv_ref[...], preferred_element_type=jnp.float32)

    # Lane-aligned slices (128-wide each) — no re-layout needed.
    q = qkv[:, 0 * DIM:1 * DIM].astype(jnp.bfloat16)
    k = qkv[:, 1 * DIM:2 * DIM].astype(jnp.bfloat16)
    v = qkv[:, 2 * DIM:3 * DIM].astype(jnp.bfloat16)

    # s = q @ k^T (scale pre-folded), contracting last dims so no explicit
    # transpose of k is materialized in VMEM.
    s = jax.lax.dot_general(q, k, (((1,), (1,)), ((), ())),
                            preferred_element_type=jnp.float32)  # (SEQ, SEQ)

    # Numerically-stable softmax over the last dim (f32 throughout — v5e has
    # no bf16 EUP/VPU path).  Matches nn.Softmax(dim=-1).
    s = s - jnp.max(s, axis=-1, keepdims=True)
    p = jnp.exp(s)
    p = p * pl.reciprocal(jnp.sum(p, axis=-1, keepdims=True), approx=True)

    # dropout(p=0.0) is the identity — skipped.

    ctx = jnp.dot(p.astype(jnp.bfloat16), v,
                  preferred_element_type=jnp.float32)            # (SEQ, DIM)
    out = jnp.dot(ctx.astype(jnp.bfloat16), wo_ref[...],
                  preferred_element_type=jnp.float32) + bo_ref[...]
    o_ref[...] = out.astype(o_ref.dtype)


def attention_forward(x, wqkv, wo, bo):
    """x: (SEQ, DIM) f32.
    wqkv: (DIM, 3*DIM) bf16 = [Wq/sqrt(DIM) | Wk | Wv] in 'x @ W' form.
    wo:   (DIM, DIM) bf16.
    bo:   (1, DIM) f32, pre-folded as bv @ Wo + bo."""
    vmem = pl.BlockSpec(memory_space=pltpu.MemorySpace.VMEM)
    seq, dim = x.shape
    flops = (2 * seq * dim * 3 * dim      # fused qkv projection
             + 2 * seq * dim * seq        # q k^T
             + 2 * seq * seq * dim        # p @ v
             + 2 * seq * dim * dim)       # output projection
    bytes_accessed = (4 * (x.size + bo.size + seq * dim)       # f32 in/out/bias
                      + 2 * (wqkv.size + wo.size))             # bf16 weights
    cost = pl.CostEstimate(flops=flops,
                           transcendentals=seq * seq + seq,    # exp + reciprocal
                           bytes_accessed=bytes_accessed)
    return pl.pallas_call(
        attention_kernel,
        out_shape=jax.ShapeDtypeStruct((seq, dim), jnp.float32),
        in_specs=[vmem] * 4,
        out_specs=vmem,
        cost_estimate=cost,
    )(x, wqkv, wo, bo)


def reference_forward(x, wq, wk, wv, bv, wo, bo):
    q = x @ wq                       # Linear(bias=False)
    k = x @ wk                       # Linear(bias=False)
    v = x @ wv + bv                  # Linear(bias=True)
    s = (q @ k.T) / math.sqrt(DIM)
    p = jax.nn.softmax(s, axis=-1)
    return (p @ v) @ wo + bo         # Linear(bias=True)


if __name__ == "__main__":
    key = jax.random.PRNGKey(0)
    kx, kq, kk, kv, kbv, ko, kbo = jax.random.split(key, 7)

    # Deterministic synthetic parameters. PyTorch Linear stores W as (out,in);
    # we store the transposed (in,out) form directly so the kernel does x @ W.
    bound = 1.0 / math.sqrt(DIM)
    x = jax.random.normal(kx, (SEQ, DIM), dtype=jnp.float32)
    wq = jax.random.uniform(kq, (DIM, DIM), jnp.float32, -bound, bound)
    wk = jax.random.uniform(kk, (DIM, DIM), jnp.float32, -bound, bound)
    wv = jax.random.uniform(kv, (DIM, DIM), jnp.float32, -bound, bound)
    bv = jax.random.uniform(kbv, (1, DIM), jnp.float32, -bound, bound)
    wo = jax.random.uniform(ko, (DIM, DIM), jnp.float32, -bound, bound)
    bo = jax.random.uniform(kbo, (1, DIM), jnp.float32, -bound, bound)

    # One-time host-side weight prep (constant-foldable, not per-call work):
    #  - fold the 1/sqrt(d_k) softmax scale into Wq,
    #  - fuse Q/K/V weights into one (DIM, 3*DIM) bf16 matrix,
    #  - fold the value bias through the output projection: bo' = bv @ Wo + bo
    #    (exact because softmax rows sum to 1).
    scale = jnp.float32(1.0 / math.sqrt(DIM))
    wqkv = jnp.concatenate([wq * scale, wk, wv], axis=1).astype(jnp.bfloat16)
    wo_bf16 = wo.astype(jnp.bfloat16)
    bo_fold = (bv @ wo + bo).astype(jnp.float32)                 # (1, DIM)

    out = attention_forward(x, wqkv, wo_bf16, bo_fold)
    jax.block_until_ready(out)

    ref = reference_forward(x, wq, wk, wv, bv, wo, bo)
    assert out.shape == (SEQ, DIM)
    # bf16 MXU operands + approx-reciprocal softmax normalization: expect
    # ~1e-2-level deviation from the pure-f32 reference.
    assert jnp.allclose(out, ref, atol=2e-2, rtol=2e-2), "mismatch vs reference"

    print("KERNEL_OK")
</pallas_src>

<mosaic_0001>
module attributes {stable_mosaic.version = 11 : i64} {
  func.func @attention_kernel(%arg0: memref<128x128xf32, #tpu.memory_space<vmem>>, %arg1: memref<128x384xbf16, #tpu.memory_space<vmem>>, %arg2: memref<128x128xbf16, #tpu.memory_space<vmem>>, %arg3: memref<1x128xf32, #tpu.memory_space<vmem>>, %arg4: memref<128x128xf32, #tpu.memory_space<vmem>>) attributes {dimension_semantics = [], scalar_prefetch = 0 : i64, scratch_operands = 0 : i64, tpu.core_type = #tpu.core_type<tc>} {
    %c0 = arith.constant 0 : index
    %c0_0 = arith.constant 0 : index
    %0 = vector.load %arg0[%c0, %c0_0] : memref<128x128xf32, #tpu.memory_space<vmem>>, vector<128x128xf32>
    %1 = arith.truncf %0 : vector<128x128xf32> to vector<128x128xbf16>
    %c0_1 = arith.constant 0 : index
    %c0_2 = arith.constant 0 : index
    %2 = vector.load %arg1[%c0_1, %c0_2] : memref<128x384xbf16, #tpu.memory_space<vmem>>, vector<128x384xbf16>
    %cst = arith.constant dense<0.000000e+00> : vector<128x384xf32>
    %3 = tpu.matmul %1, %2, %cst {dimension_numbers = #tpu.dot_dimension_numbers<[1], [0], [0], [1], [0, 0, 1, 1], [], []>} : vector<128x128xbf16>, vector<128x384xbf16>, vector<128x384xf32> -> vector<128x384xf32>
    %4 = vector.extract_strided_slice %3 {offsets = [0, 0], sizes = [128, 128], strides = [1, 1]} : vector<128x384xf32> to vector<128x128xf32>
    %5 = arith.truncf %4 : vector<128x128xf32> to vector<128x128xbf16>
    %6 = vector.extract_strided_slice %3 {offsets = [0, 128], sizes = [128, 128], strides = [1, 1]} : vector<128x384xf32> to vector<128x128xf32>
    %7 = arith.truncf %6 : vector<128x128xf32> to vector<128x128xbf16>
    %8 = vector.extract_strided_slice %3 {offsets = [0, 256], sizes = [128, 128], strides = [1, 1]} : vector<128x384xf32> to vector<128x128xf32>
    %9 = arith.truncf %8 : vector<128x128xf32> to vector<128x128xbf16>
    %cst_3 = arith.constant dense<0.000000e+00> : vector<128x128xf32>
    %10 = tpu.matmul %5, %7, %cst_3 {dimension_numbers = #tpu.dot_dimension_numbers<[1], [1], [0], [0], [0, 0, 1, 0], [], []>} : vector<128x128xbf16>, vector<128x128xbf16>, vector<128x128xf32> -> vector<128x128xf32>
    %cst_4 = arith.constant dense<0xFF800000> : vector<128xf32>
    %11 = vector.multi_reduction <maximumf>, %10, %cst_4 [1] : vector<128x128xf32> to vector<128xf32>
    %12 = vector.shape_cast %11 : vector<128xf32> to vector<128x1xf32>
    %13 = vector.broadcast %12 : vector<128x1xf32> to vector<128x128xf32>
    %14 = arith.subf %10, %13 : vector<128x128xf32>
    %15 = math.exp %14 : vector<128x128xf32>
    %cst_5 = arith.constant dense<0.000000e+00> : vector<128xf32>
    %16 = vector.multi_reduction <add>, %15, %cst_5 [1] : vector<128x128xf32> to vector<128xf32>
    %17 = vector.shape_cast %16 : vector<128xf32> to vector<128x1xf32>
    %18 = tpu.reciprocal %17 {approx = true} : vector<128x1xf32> -> vector<128x1xf32>
    %19 = vector.broadcast %18 : vector<128x1xf32> to vector<128x128xf32>
    %20 = arith.mulf %15, %19 : vector<128x128xf32>
    %21 = arith.truncf %20 : vector<128x128xf32> to vector<128x128xbf16>
    %cst_6 = arith.constant dense<0.000000e+00> : vector<128x128xf32>
    %22 = tpu.matmul %21, %9, %cst_6 {dimension_numbers = #tpu.dot_dimension_numbers<[1], [0], [0], [1], [0, 0, 1, 1], [], []>} : vector<128x128xbf16>, vector<128x128xbf16>, vector<128x128xf32> -> vector<128x128xf32>
    %23 = arith.truncf %22 : vector<128x128xf32> to vector<128x128xbf16>
    %c0_7 = arith.constant 0 : index
    %c0_8 = arith.constant 0 : index
    %24 = vector.load %arg2[%c0_7, %c0_8] : memref<128x128xbf16, #tpu.memory_space<vmem>>, vector<128x128xbf16>
    %cst_9 = arith.constant dense<0.000000e+00> : vector<128x128xf32>
    %25 = tpu.matmul %23, %24, %cst_9 {dimension_numbers = #tpu.dot_dimension_numbers<[1], [0], [0], [1], [0, 0, 1, 1], [], []>} : vector<128x128xbf16>, vector<128x128xbf16>, vector<128x128xf32> -> vector<128x128xf32>
    %c0_10 = arith.constant 0 : index
    %c0_11 = arith.constant 0 : index
    %26 = vector.load %arg3[%c0_10, %c0_11] : memref<1x128xf32, #tpu.memory_space<vmem>>, vector<1x128xf32>
    %27 = vector.broadcast %26 : vector<1x128xf32> to vector<128x128xf32>
    %28 = arith.addf %25, %27 : vector<128x128xf32>
    %c0_12 = arith.constant 0 : index
    %c0_13 = arith.constant 0 : index
    %29 = vector.load %arg4[%c0_12, %c0_13] : memref<128x128xf32, #tpu.memory_space<vmem>>, vector<128x128xf32>
    tpu.vector_store %arg4[%c0_12, %c0_13], %28 {strides = array<i32>} : memref<128x128xf32, #tpu.memory_space<vmem>>, vector<128x128xf32>,
    return
  }
}

</mosaic_0001>

<bundles_post_ra>
// kernel: tpu_custom_call.1
= control target key start
LH: loop header
LB: loop body
LE: loop exit
PB: predicated region body
PF: predicated region fallthrough
CT: control target
= control target key end

     0   :  { %9 = vsyncpa [#allocation3], 0  ;;  %s1697_s0 = inlined_call_operand.hbm [shape: f32[128,128], index: 0, kind: input, shape index: {}]   ;;  %s1698_s1 = inlined_call_operand.hbm [shape: bf16[128,384], index: 1, kind: input, shape index: {}]   ;;  %s1699_s2 = inlined_call_operand.hbm [shape: bf16[128,128], index: 2, kind: input, shape index: {}]   ;;  %s1700_s3 = inlined_call_operand.vmem [shape: f32[1,128], index: 3, kind: input, shape index: {}]   ;;  %s1701_s4 = inlined_call_operand.hbm [shape: f32[128,128], index: 4, kind: output, shape index: {}]  }
   0x1   :  { %10 = vsyncpa [#allocation6], 0 }
   0x2   :  { %11 = vsyncpa [#allocation4], 0  ;;  %s1468_s15 = smov [#allocation5]   ;;  %s1374_s19 = scalar_lea.hbm %s1698_s1, 3072 }
   0x3   :  { %s29_s16 = sshll.u32 %s1468_s15, 4  ;;  %p1375_p0 = scmp.ne.s32.totalorder %s1698_s1, %s1374_s19  ;;  %s30_s16 = int_to_ptr.vmem [resolvable:$true] %s29_s16 }
   0x4   :  { %p1378_p1 = scmp.lt.u32.totalorder %s1374_s19, %s1698_s1 }
   0x6   :  { %p1380_p2 = pnand %p1378_p1, %p1375_p0 }
   0x8   :  { %1383 = shalt.err (!%p1380_p2)
}
   0x9   :  { %s1384_s24 = scalar_lea.vmem %s30_s16, 3072  ;;  %p1389_p4 = scmp.lt.s32.totalorder %s30_s16, %s30_s16 }
   0xa   :  { %p1385_p3 = scmp.ne.s32.totalorder %s30_s16, %s1384_s24  ;;  %p1390_p5 = scmp.lt.s32.totalorder %s1384_s24, %s1384_s24 }
   0xc   :  { %p1391_p6 = por %p1390_p5, %p1389_p4 }
   0xe   :  { %p1392_p7 = pnand %p1391_p6, %p1385_p3 }
  0x10   :  { %1395 = shalt.err (!%p1392_p7)
}
  0x11   :  { %s1469_s25 = smov 192   ;;  %s1470_s26 = smov 12  }
  0x12   :  { %35 = dma.hbm_to_vmem [thread:$0]  %s1698_s1, 3072, %s30_s16, [#allocation6], %s1469_s25, %s1469_s25, %s1470_s26  }
  0x13   :  { %s1471_s29 = smov [#allocation2]   ;;  %s1396_s7 = scalar_lea.hbm %s1697_s0, 2048 }
  0x14   :  { %s17_s30 = sshll.u32 %s1471_s29, 4  ;;  %p1397_p8 = scmp.ne.s32.totalorder %s1697_s0, %s1396_s7  ;;  %s18_s30 = int_to_ptr.vmem [resolvable:$true] %s17_s30 }
  0x15   :  { %p1400_p9 = scmp.lt.u32.totalorder %s1396_s7, %s1697_s0 }
  0x17   :  { %p1402_p10 = pnand %p1400_p9, %p1397_p8 }
  0x19   :  { %1405 = shalt.err (!%p1402_p10)
}
  0x1a   :  { %s1406_s12 = scalar_lea.vmem %s18_s30, 2048  ;;  %p1411_p12 = scmp.lt.s32.totalorder %s18_s30, %s18_s30 }
  0x1b   :  { %p1407_p11 = scmp.ne.s32.totalorder %s18_s30, %s1406_s12  ;;  %p1412_p13 = scmp.lt.s32.totalorder %s1406_s12, %s1406_s12 }
  0x1d   :  { %p1413_p0 = por %p1412_p13, %p1411_p12 }
  0x1f   :  { %p1414_p1 = pnand %p1413_p0, %p1407_p11 }
  0x21   :  { %1417 = shalt.err (!%p1414_p1)
}
  0x22   :  { %s1472_s1 = smov 128   ;;  %s1473_s13 = smov 8  }
  0x23   :  { %23 = dma.hbm_to_vmem [thread:$0]  %s1697_s0, 2048, %s18_s30, [#allocation3], %s1472_s1, %s1472_s1, %s1473_s13  }
  0x24   :  { %s1474_s16 = smov [#allocation7]   ;;  %s1418_s20 = scalar_lea.hbm %s1699_s2, 1024 }
  0x25   :  { %s41_s17 = sshll.u32 %s1474_s16, 4  ;;  %p1419_p2 = scmp.ne.s32.totalorder %s1699_s2, %s1418_s20  ;;  %s42_s17 = int_to_ptr.vmem [resolvable:$true] %s41_s17 }
  0x26   :  { %p1422_p3 = scmp.lt.u32.totalorder %s1418_s20, %s1699_s2 }
  0x28   :  { %p1424_p4 = pnand %p1422_p3, %p1419_p2 }
  0x2a   :  { %1427 = shalt.err (!%p1424_p4)
}
  0x2b   :  { %s1428_s25 = scalar_lea.vmem %s42_s17, 1024  ;;  %p1433_p6 = scmp.lt.s32.totalorder %s42_s17, %s42_s17 }
  0x2c   :  { %p1429_p5 = scmp.ne.s32.totalorder %s42_s17, %s1428_s25  ;;  %p1434_p7 = scmp.lt.s32.totalorder %s1428_s25, %s1428_s25 }
  0x2e   :  { %p1435_p8 = por %p1434_p7, %p1433_p6 }
  0x30   :  { %p1436_p9 = pnand %p1435_p8, %p1429_p5 }
  0x32   :  { %1439 = shalt.err (!%p1436_p9)
}
  0x33   :  { %s1475_s0 = smov 64   ;;  %s1476_s26 = smov 4  }
  0x34   :  { %47 = dma.hbm_to_vmem [thread:$0]  %s1699_s2, 1024, %s42_s17, [#allocation6], %s1475_s0, %s1475_s0, %s1476_s26  }
  0x35   :  { %1462 = dma.done.wait [#allocation3], 2048  }
  0x36   :  { %1463 = vsyncadd [#allocation3], 4294965248 }
  0x37   :  { %1464 = dma.done.wait [#allocation6], 4096  }
  0x38   :  { %1465 = vsyncadd [#allocation6], 4294963200  ;;  %v1477_v0 = vmov 0   ;;  %v1270_v1 = vld [vmem:[#allocation5 + $0x4] ss:$12 sps:$4 sm:$0xff]   ;;  %v61_v10 = vld [vmem:[#allocation2 + $0x8] sm:$0xff] }
  0x39   :  { %276 = vmatprep.mubr.bf16.mxu0 %v1477_v0  ;;  %v1272_v2 = vld [vmem:[#allocation5] ss:$12 sps:$4 sm:$0xff]   ;;  %244 = vmatprep.subr.bf16.mxu0 %v1270_v1  ;;  %v1273_v3 = vld [vmem:[#allocation5 + $0x1c] ss:$12 sps:$4 sm:$0xff]   ;;  %v1275_v4 = vld [vmem:[#allocation5 + $0x18] ss:$12 sps:$4 sm:$0xff]  }
  0x3a   :  { %245 = vmatpush1.bf16.msra.mxu0 %v1272_v2  ;;  %v1276_v5 = vld [vmem:[#allocation5 + $0x34] ss:$12 sps:$4 sm:$0xff]   ;;  %v1278_v6 = vld [vmem:[#allocation5 + $0x30] ss:$12 sps:$4 sm:$0xff]   ;;  %v1279_v7 = vld [vmem:[#allocation5 + $0x4c] ss:$12 sps:$4 sm:$0xff]  }
  0x3b   :  { %246 = vmatprep.subr.bf16.mxu0 %v1273_v3  ;;  %v60_v8 = vld [vmem:[#allocation2] sm:$0xff]  ;;  %v1281_v9 = vld [vmem:[#allocation5 + $0x48] ss:$12 sps:$4 sm:$0xff]   ;;  %v1290_v17 = vld [vmem:[#allocation5 + $0x90] ss:$12 sps:$4 sm:$0xff]  }
  0x3c   :  { %v1282_v11 = vld [vmem:[#allocation5 + $0x64] ss:$12 sps:$4 sm:$0xff]   ;;  %v76_v12 = vpack.c.bf16 %v61_v10, %v60_v8  ;;  %v1284_v13 = vld [vmem:[#allocation5 + $0x60] ss:$12 sps:$4 sm:$0xff]   ;;  %v1285_v14 = vld [vmem:[#allocation5 + $0x7c] ss:$12 sps:$4 sm:$0xff]  }
  0x3d   :  { %v1287_v15 = vld [vmem:[#allocation5 + $0x78] ss:$12 sps:$4 sm:$0xff]   ;;  %v1288_v16 = vld [vmem:[#allocation5 + $0x94] ss:$12 sps:$4 sm:$0xff]   ;;  %v65_v24 = vld [vmem:[#allocation2 + $0x28] sm:$0xff] }
  0x3e   :  { %247 = vmatpush1.bf16.msra.mxu0 %v1275_v4  ;;  %1147 = vmatprep.mubr.bf16.mxu1 %v76_v12  ;;  %v1291_v18 = vld [vmem:[#allocation5 + $0xac] ss:$12 sps:$4 sm:$0xff]   ;;  %v1293_v19 = vld [vmem:[#allocation5 + $0xa8] ss:$12 sps:$4 sm:$0xff]   ;;  %v64_v23 = vld [vmem:[#allocation2 + $0x20] sm:$0xff] }
  0x3f   :  { %248 = vmatprep.subr.bf16.mxu0 %v1276_v5  ;;  %v62_v20 = vld [vmem:[#allocation2 + $0x10] sm:$0xff]  ;;  %v63_v21 = vld [vmem:[#allocation2 + $0x18] sm:$0xff]  ;;  %v1549_v25 = vpack.c.bf16 %v65_v24, %v64_v23  ;;  %v68_v29 = vld [vmem:[#allocation2 + $0x40] sm:$0xff] }
  0x40   :  { %v1545_v22 = vpack.c.bf16 %v63_v21, %v62_v20  ;;  %v66_v26 = vld [vmem:[#allocation2 + $0x30] sm:$0xff]  ;;  %v67_v27 = vld [vmem:[#allocation2 + $0x38] sm:$0xff]  ;;  %v69_v30 = vld [vmem:[#allocation2 + $0x48] sm:$0xff] }
  0x41   :  { %v1553_v28 = vpack.c.bf16 %v67_v27, %v66_v26  ;;  %v1557_v31 = vpack.c.bf16 %v69_v30, %v68_v29  ;;  %v70_v32 = vld [vmem:[#allocation2 + $0x50] sm:$0xff]  ;;  %v71_v33 = vld [vmem:[#allocation2 + $0x58] sm:$0xff]  ;;  %v72_v35 = vld [vmem:[#allocation2 + $0x60] sm:$0xff] }
  0x42   :  { %249 = vmatpush1.bf16.msra.mxu0 %v1278_v6  ;;  %v1561_v34 = vpack.c.bf16 %v71_v33, %v70_v32  ;;  %v73_v36 = vld [vmem:[#allocation2 + $0x68] sm:$0xff]  ;;  %v74_v38 = vld [vmem:[#allocation2 + $0x70] sm:$0xff]  ;;  %v75_v39 = vld [vmem:[#allocation2 + $0x78] sm:$0xff] }
  0x43   :  { %250 = vmatprep.subr.bf16.mxu0 %v1279_v7  ;;  %v1565_v37 = vpack.c.bf16 %v73_v36, %v72_v35  ;;  %v1569_v40 = vpack.c.bf16 %v75_v39, %v74_v38  ;;  %v1294_v27 = vld [vmem:[#allocation5 + $0x8] ss:$12 sps:$4 sm:$0xff]   ;;  %v1295_v29 = vld [vmem:[#allocation5 + $0x20] ss:$12 sps:$4 sm:$0xff]   ;;  %v1296_v30 = vld [vmem:[#allocation5 + $0x38] ss:$12 sps:$4 sm:$0xff]  }
  0x44   :  { %1131 = vmatprep.subr.bf16.mxu1 %v1294_v27  ;;  %v1297_v32 = vld [vmem:[#allocation5 + $0x50] ss:$12 sps:$4 sm:$0xff]   ;;  %v1298_v33 = vld [vmem:[#allocation5 + $0x68] ss:$12 sps:$4 sm:$0xff]   ;;  %v1299_v35 = vld [vmem:[#allocation5 + $0x80] ss:$12 sps:$4 sm:$0xff]  }
  0x45   :  { %1132 = vmatpush3.bf16.msra.mxu1 %v1294_v27  ;;  %v1300_v36 = vld [vmem:[#allocation5 + $0x98] ss:$12 sps:$4 sm:$0xff]   ;;  %v1301_v38 = vld [vmem:[#allocation5 + $0xb0] ss:$12 sps:$4 sm:$0xff]  }
  0x46   :  { %251 = vmatpush1.bf16.msra.mxu0 %v1281_v9  ;;  %1133 = vmatprep.subr.bf16.mxu1 %v1295_v29 }
  0x47   :  { %252 = vmatprep.subr.bf16.mxu0 %v1282_v11 }
  0x49   :  { %1134 = vmatpush3.bf16.msra.mxu1 %v1295_v29 }
  0x4a   :  { %253 = vmatpush1.bf16.msra.mxu0 %v1284_v13  ;;  %1135 = vmatprep.subr.bf16.mxu1 %v1296_v30 }
  0x4b   :  { %254 = vmatprep.subr.bf16.mxu0 %v1285_v14 }
  0x4d   :  { %1136 = vmatpush3.bf16.msra.mxu1 %v1296_v30 }
  0x4e   :  { %255 = vmatpush1.bf16.msra.mxu0 %v1287_v15  ;;  %1137 = vmatprep.subr.bf16.mxu1 %v1297_v32 }
  0x4f   :  { %256 = vmatprep.subr.bf16.mxu0 %v1288_v16 }
  0x51   :  { %1138 = vmatpush3.bf16.msra.mxu1 %v1297_v32 }
  0x52   :  { %257 = vmatpush1.bf16.msra.mxu0 %v1290_v17  ;;  %1139 = vmatprep.subr.bf16.mxu1 %v1298_v33 }
  0x53   :  { %258 = vmatprep.subr.bf16.mxu0 %v1291_v18 }
  0x55   :  { %1140 = vmatpush3.bf16.msra.mxu1 %v1298_v33 }
  0x56   :  { %259 = vmatpush1.bf16.msra.mxu0 %v1293_v19  ;;  %1141 = vmatprep.subr.bf16.mxu1 %v1299_v35 }
  0x59   :  { %277 = vmatmul.mubr.bf16.vlgmr.msra.gmra.mrb[0].mxu0 %v76_v12  ;;  %1142 = vmatpush3.bf16.msra.mxu1 %v1299_v35 }
  0x5a   :  { %286 = vmatprep.mubr.bf16.mxu0 %v1477_v0  ;;  %1143 = vmatprep.subr.bf16.mxu1 %v1300_v36 }
  0x5d   :  { %1144 = vmatpush3.bf16.msra.mxu1 %v1300_v36 }
  0x5e   :  { %1145 = vmatprep.subr.bf16.mxu1 %v1301_v38 }
  0x61   :  { %287 = vmatmul.mubr.bf16.gmra.mrb[4].mxu0 %v1545_v22  ;;  %1146 = vmatpush3.bf16.msra.mxu1 %v1301_v38 }
  0x62   :  { %296 = vmatprep.mubr.bf16.mxu0 %v1477_v0 }
  0x64   :  { %1148 = vmatmul.mubr.bf16.vlgmr.msra.gmra.mrb[0].mxu1 %v1545_v22 }
  0x65   :  { %1151 = vmatprep.mubr.bf16.mxu1 %v1549_v25 }
  0x69   :  { %297 = vmatmul.mubr.bf16.gmra.mrb[8].mxu0 %v1549_v25 }
  0x6a   :  { %306 = vmatprep.mubr.bf16.mxu0 %v1477_v0 }
  0x6c   :  { %1152 = vmatmul.mubr.bf16.gmra.mrb[4].mxu1 %v1553_v28 }
  0x6d   :  { %1155 = vmatprep.mubr.bf16.mxu1 %v1557_v31 }
  0x71   :  { %307 = vmatmul.mubr.bf16.gmra.mrb[12].mxu0 %v1553_v28 }
  0x72   :  { %316 = vmatprep.mubr.bf16.mxu0 %v1477_v0 }
  0x74   :  { %1156 = vmatmul.mubr.bf16.gmra.mrb[8].mxu1 %v1561_v34 }
  0x75   :  { %1159 = vmatprep.mubr.bf16.mxu1 %v1565_v37 }
  0x79   :  { %317 = vmatmul.mubr.bf16.gmra.mrb[16].mxu0 %v1557_v31 }
  0x7a   :  { %326 = vmatprep.mubr.bf16.mxu0 %v1477_v0 }
  0x7c   :  { %1160 = vmatmul.mubr.bf16.gmra.mrb[12].mxu1 %v1569_v40 }
  0x81   :  { %327 = vmatmul.mubr.bf16.gmra.mrb[20].mxu0 %v1561_v34 }
  0x82   :  { %336 = vmatprep.mubr.bf16.mxu0 %v1477_v0 }
  0x89   :  { %337 = vmatmul.mubr.bf16.gmra.mrb[24].mxu0 %v1565_v37 }
  0x8a   :  { %346 = vmatprep.mubr.bf16.mxu0 %v1477_v0 }
  0x91   :  { %347 = vmatmul.mubr.bf16.gmra.mrb[28].mxu0 %v1569_v40 }
 0x12c   :  { %v278_v41 = vpop.f32.mrb[0].mxu0 }
 0x12d   :  { %v280_v42 = vpop.f32.mrb[1].mxu0 }
 0x12e   :  { %v282_v43 = vpop.f32.mrb[2].mxu0 }
 0x12f   :  { %v454_v44 = vpack.c.bf16 %v282_v43, %v278_v41  ;;  %v284_v45 = vpop.f32.mrb[3].mxu0 }
 0x130   :  { %v462_v46 = vpack.c.bf16 %v284_v45, %v280_v42 }
 0x131   :  { %1179 = vmatprep.mubr.bf16.mxu0 %v454_v44 }
 0x132   :  { %1163 = vmatprep.subr.bf16.mxu0 %v462_v46 }
 0x133   :  { %1164 = vmatpush3.bf16.xpose.msra.mxu0 %v462_v46 }
 0x134   :  { %v288_v47 = vpop.f32.mrb[4].mxu0 }
 0x135   :  { %v290_v48 = vpop.f32.mrb[5].mxu0 }
 0x136   :  { %v292_v49 = vpop.f32.mrb[6].mxu0 }
 0x137   :  { %v455_v50 = vpack.c.bf16 %v292_v49, %v288_v47  ;;  %v294_v51 = vpop.f32.mrb[7].mxu0 }
 0x138   :  { %v463_v52 = vpack.c.bf16 %v294_v51, %v290_v48 }
 0x13a   :  { %1165 = vmatprep.subr.bf16.mxu0 %v463_v52 }
 0x13b   :  { %1166 = vmatpush3.bf16.xpose.msra.mxu0 %v463_v52 }
 0x13c   :  { %v298_v53 = vpop.f32.mrb[8].mxu0 }
 0x13d   :  { %v300_v54 = vpop.f32.mrb[9].mxu0 }
 0x13e   :  { %v302_v55 = vpop.f32.mrb[10].mxu0 }
 0x13f   :  { %v456_v56 = vpack.c.bf16 %v302_v55, %v298_v53  ;;  %v304_v57 = vpop.f32.mrb[11].mxu0 }
 0x140   :  { %v464_v58 = vpack.c.bf16 %v304_v57, %v300_v54 }
 0x142   :  { %1167 = vmatprep.subr.bf16.mxu0 %v464_v58 }
 0x143   :  { %1168 = vmatpush3.bf16.xpose.msra.mxu0 %v464_v58 }
 0x144   :  { %v308_v59 = vpop.f32.mrb[12].mxu0 }
 0x145   :  { %v310_v60 = vpop.f32.mrb[13].mxu0 }
 0x146   :  { %v312_v61 = vpop.f32.mrb[14].mxu0 }
 0x147   :  { %v457_v62 = vpack.c.bf16 %v312_v61, %v308_v59  ;;  %v314_v63 = vpop.f32.mrb[15].mxu0  ;;  %v1149_v59 = vpop.f32.mrb[0].mxu1 }
 0x148   :  { %v465_v0 = vpack.c.bf16 %v314_v63, %v310_v60  ;;  %v391_v61 = vpop.f32.mrb[1].mxu1 }
 0x14a   :  { %1169 = vmatprep.subr.bf16.mxu0 %v465_v0 }
 0x14b   :  { %1170 = vmatpush3.bf16.xpose.msra.mxu0 %v465_v0  ;;  %v1150_v0 = vpop.f32.mrb[2].mxu1 }
 0x14c   :  { %v318_v1 = vpop.f32.mrb[16].mxu0 }
 0x14d   :  { %v320_v2 = vpop.f32.mrb[17].mxu0 }
 0x14e   :  { %v322_v3 = vpop.f32.mrb[18].mxu0 }
 0x14f   :  { %v458_v4 = vpack.c.bf16 %v322_v3, %v318_v1  ;;  %v324_v5 = vpop.f32.mrb[19].mxu0  ;;  %v394_v3 = vpop.f32.mrb[3].mxu1 }
 0x150   :  { %v466_v6 = vpack.c.bf16 %v324_v5, %v320_v2  ;;  %v471_v2 = vpack.c.bf16 %v1150_v0, %v1149_v59  ;;  %v470_v5 = vpack.c.bf16 %v394_v3, %v391_v61 }
 0x152   :  { %1171 = vmatprep.subr.bf16.mxu0 %v466_v6  ;;  %1195 = vmatprep.subr.bf16.mxu1 %v470_v5 }
 0x153   :  { %1172 = vmatpush3.bf16.xpose.msra.mxu0 %v466_v6  ;;  %1196 = vmatpush3.bf16.msra.mxu1 %v470_v5 }
 0x154   :  { %v328_v7 = vpop.f32.mrb[20].mxu0  ;;  %1197 = vmatprep.subr.bf16.mxu1 %v471_v2 }
 0x155   :  { %v330_v8 = vpop.f32.mrb[21].mxu0 }
 0x156   :  { %v332_v9 = vpop.f32.mrb[22].mxu0 }
 0x157   :  { %v459_v10 = vpack.c.bf16 %v332_v9, %v328_v7  ;;  %v334_v11 = vpop.f32.mrb[23].mxu0  ;;  %1198 = vmatpush3.bf16.msra.mxu1 %v471_v2 }
 0x158   :  { %v467_v12 = vpack.c.bf16 %v334_v11, %v330_v8 }
 0x15a   :  { %1173 = vmatprep.subr.bf16.mxu0 %v467_v12 }
 0x15b   :  { %1174 = vmatpush3.bf16.xpose.msra.mxu0 %v467_v12  ;;  %v1153_v12 = vpop.f32.mrb[4].mxu1 }
 0x15c   :  { %v338_v13 = vpop.f32.mrb[24].mxu0 }
 0x15d   :  { %v340_v14 = vpop.f32.mrb[25].mxu0 }
 0x15e   :  { %v342_v15 = vpop.f32.mrb[26].mxu0 }
 0x15f   :  { %v460_v16 = vpack.c.bf16 %v342_v15, %v338_v13  ;;  %v344_v17 = vpop.f32.mrb[27].mxu0 }
 0x160   :  { %v468_v18 = vpack.c.bf16 %v344_v17, %v340_v14 }
 0x162   :  { %1175 = vmatprep.subr.bf16.mxu0 %v468_v18 }
 0x163   :  { %1176 = vmatpush3.bf16.xpose.msra.mxu0 %v468_v18 }
 0x164   :  { %v348_v19 = vpop.f32.mrb[28].mxu0 }
 0x165   :  { %v350_v20 = vpop.f32.mrb[29].mxu0 }
 0x166   :  { %v352_v21 = vpop.f32.mrb[30].mxu0 }
 0x167   :  { %v461_v23 = vpack.c.bf16 %v352_v21, %v348_v19  ;;  %v354_v24 = vpop.f32.mrb[31].mxu0 }
 0x168   :  { %v469_v26 = vpack.c.bf16 %v354_v24, %v350_v20 }
 0x16a   :  { %1177 = vmatprep.subr.bf16.mxu0 %v469_v26 }
 0x16b   :  { %1178 = vmatpush3.bf16.xpose.msra.mxu0 %v469_v26 }
 0x172   :  { %1180 = vmatmul.mubr.bf16.vlgmr.msra.gmra.mrb[32].mxu0 %v455_v50 }
 0x173   :  { %1183 = vmatprep.mubr.bf16.mxu0 %v456_v56 }
 0x17a   :  { %1184 = vmatmul.mubr.bf16.gmra.mrb[36].mxu0 %v457_v62 }
 0x17b   :  { %1187 = vmatprep.mubr.bf16.mxu0 %v458_v4 }
 0x182   :  { %1188 = vmatmul.mubr.bf16.gmra.mrb[40].mxu0 %v459_v10 }
 0x183   :  { %1191 = vmatprep.mubr.bf16.mxu0 %v460_v16  ;;  %v407_v16 = vpop.f32.mrb[5].mxu1 }
 0x184   :  { %v1154_v18 = vpop.f32.mrb[6].mxu1 }
 0x185   :  { %v473_v21 = vpack.c.bf16 %v1154_v18, %v1153_v12 }
 0x18a   :  { %1192 = vmatmul.mubr.bf16.gmra.mrb[44].mxu0 %v461_v23  ;;  %v410_v23 = vpop.f32.mrb[7].mxu1 }
 0x18b   :  { %v472_v27 = vpack.c.bf16 %v410_v23, %v407_v16 }
 0x18d   :  { %1199 = vmatprep.subr.bf16.mxu1 %v472_v27 }
 0x18e   :  { %1200 = vmatpush3.bf16.msra.mxu1 %v472_v27 }
 0x18f   :  { %1201 = vmatprep.subr.bf16.mxu1 %v473_v21 }
 0x192   :  { %1202 = vmatpush3.bf16.msra.mxu1 %v473_v21 }
 0x245   :  { %v1181_v39 = vpop.f32.mrb[32].mxu0 }
 0x246   :  { %579 = vmax.xlane.f32.xlu1 %v1181_v39  ;;  %v512_v41 = vpop.f32.mrb[33].mxu0 }
 0x247   :  { %575 = vmax.xlane.f32.xlu0 %v512_v41  ;;  %v1182_v42 = vpop.f32.mrb[34].mxu0 }
 0x248   :  { %v515_v43 = vpop.f32.mrb[35].mxu0 }
 0x24a   :  { %581 = vmax.xlane.f32.xlu1 %v1182_v42 }
 0x24b   :  { %577 = vmax.xlane.f32.xlu0 %v515_v43 }
 0x24d   :  { %v1185_v22 = vpop.f32.mrb[36].mxu0 }
 0x24e   :  { %v528_v25 = vpop.f32.mrb[37].mxu0 }
 0x24f   :  { %583 = vmax.xlane.f32.xlu0 %v528_v25  ;;  %v1579_v28 = vpop.f32.mrb[38].mxu0 }
 0x250   :  { %v531_v31 = vpop.f32.mrb[39].mxu0 }
 0x251   :  { %585 = vmax.xlane.f32.xlu1 %v531_v31 }
 0x253   :  { %587 = vmax.xlane.f32.xlu0 %v1185_v22 }
 0x255   :  { %589 = vmax.xlane.f32.xlu1 %v1579_v28  ;;  %v1582_v34 = vpop.f32.mrb[40].mxu0 }
 0x256   :  { %v1584_v37 = vpop.f32.mrb[41].mxu0 }
 0x257   :  { %591 = vmax.xlane.f32.xlu0 %v1584_v37  ;;  %v1587_v40 = vpop.f32.mrb[42].mxu0 }
 0x258   :  { %v1589_v44 = vpop.f32.mrb[43].mxu0 }
 0x259   :  { %593 = vmax.xlane.f32.xlu1 %v1589_v44 }
 0x25b   :  { %595 = vmax.xlane.f32.xlu0 %v1582_v34 }
 0x25d   :  { %597 = vmax.xlane.f32.xlu1 %v1587_v40  ;;  %v1594_v45 = vpop.f32.mrb[44].mxu0 }
 0x25e   :  { %v1596_v46 = vpop.f32.mrb[45].mxu0 }
 0x25f   :  { %599 = vmax.xlane.f32.xlu0 %v1596_v46  ;;  %v1599_v47 = vpop.f32.mrb[46].mxu0 }
 0x260   :  { %v1601_v48 = vpop.f32.mrb[47].mxu0 }
 0x261   :  { %601 = vmax.xlane.f32.xlu1 %v1601_v48 }
 0x263   :  { %603 = vmax.xlane.f32.xlu0 %v1594_v45 }
 0x265   :  { %605 = vmax.xlane.f32.xlu1 %v1599_v47 }
 0x2d3   :  { %v580_v49 = vpop.xlane.xlu1 %579 }
 0x2d4   :  { %v609_v50 = vsub.f32 %v1181_v39, %v580_v49  ;;  %v576_v51 = vpop.xlane.xlu0 %575 }
 0x2d5   :  { %v607_v52 = vsub.f32 %v512_v41, %v576_v51  ;;  %v1157_v41 = vpop.f32.mrb[8].mxu1 }
 0x2d6   :  { %v627_v55 = vmul.f32 1.442695, %v609_v50 }
 0x2d7   :  { %v623_v53 = vmul.f32 1.442695, %v607_v52  ;;  %v582_v54 = vpop.xlane.xlu1 %581 }
 0x2d8   :  { %v610_v56 = vsub.f32 %v1182_v42, %v582_v54  ;;  %v578_v57 = vpop.xlane.xlu0 %577 }
 0x2d9   :  { %1310 = vpow2.f32 %v623_v53  ;;  %v608_v58 = vsub.f32 %v515_v43, %v578_v57 }
 0x2da   :  { %1312 = vpow2.f32 %v627_v55  ;;  %v629_v62 = vmul.f32 1.442695, %v610_v56 }
 0x2db   :  { %v625_v60 = vmul.f32 1.442695, %v608_v58 }
 0x2dc   :  { %v584_v63 = vpop.xlane.xlu0 %583 }
 0x2dd   :  { %1314 = vpow2.f32 %v625_v60  ;;  %v611_v1 = vsub.f32 %v528_v25, %v584_v63  ;;  %v423_v25 = vpop.f32.mrb[9].mxu1 }
 0x2de   :  { %v586_v4 = vpop.xlane.xlu1 %585  ;;  %1316 = vpow2.f32 %v629_v62 }
 0x2df   :  { %v631_v6 = vmul.f32 1.442695, %v611_v1  ;;  %v612_v7 = vsub.f32 %v531_v31, %v586_v4  ;;  %v1158_v31 = vpop.f32.mrb[10].mxu1 }
 0x2e0   :  { %v588_v8 = vpop.xlane.xlu0 %587  ;;  %v426_v49 = vpop.f32.mrb[11].mxu1 }
 0x2e1   :  { %1318 = vpow2.f32 %v631_v6  ;;  %v633_v9 = vmul.f32 1.442695, %v612_v7  ;;  %v613_v10 = vsub.f32 %v1185_v22, %v588_v8  ;;  %v474_v52 = vpack.c.bf16 %v426_v49, %v423_v25  ;;  %v1161_v59 = vpop.f32.mrb[12].mxu1 }
 0x2e2   :  { %v590_v11 = vpop.xlane.xlu1 %589  ;;  %v439_v62 = vpop.f32.mrb[13].mxu1 }
 0x2e3   :  { %v1606_v13 = vpop.eup %1310  ;;  %v635_v14 = vmul.f32 1.442695, %v613_v10  ;;  %v614_v15 = vsub.f32 %v1579_v28, %v590_v11  ;;  %1320 = vpow2.f32 %v633_v9  ;;  %1203 = vmatprep.subr.bf16.mxu1 %v474_v52  ;;  %v1162_v63 = vpop.f32.mrb[14].mxu1  ;;  %v1302_v9 = vld [vmem:[#allocation7] sm:$0xff]  }
 0x2e4   :  { %v592_v17 = vpop.xlane.xlu0 %591  ;;  %655 = vadd.xlane.f32.xlu0 %v1606_v13  ;;  %v1611_v24 = vpop.eup %1312  ;;  %1204 = vmatpush3.bf16.msra.mxu1 %v474_v52  ;;  %v477_v0 = vpack.c.bf16 %v1162_v63, %v1161_v59 }
 0x2e5   :  { %1322 = vpow2.f32 %v635_v14  ;;  %v637_v19 = vmul.f32 1.442695, %v614_v15  ;;  %v615_v20 = vsub.f32 %v1584_v37, %v592_v17  ;;  %v442_v3 = vpop.f32.mrb[15].mxu1 }
 0x2e6   :  { %v594_v26 = vpop.xlane.xlu1 %593 }
 0x2e7   :  { %v1613_v29 = vpop.eup %1314  ;;  %v639_v30 = vmul.f32 1.442695, %v615_v20  ;;  %v616_v32 = vsub.f32 %v1589_v44, %v594_v26  ;;  %1324 = vpow2.f32 %v637_v19  ;;  %v475_v44 = vpack.c.bf16 %v1158_v31, %v1157_v41 }
 0x2e8   :  { %v596_v33 = vpop.xlane.xlu0 %595  ;;  %659 = vadd.xlane.f32.xlu0 %v1611_v24  ;;  %657 = vadd.xlane.f32.xlu1 %v1613_v29  ;;  %v1619_v38 = vpop.eup %1316 }
 0x2e9   :  { %1326 = vpow2.f32 %v639_v30  ;;  %v641_v35 = vmul.f32 1.442695, %v616_v32  ;;  %v617_v36 = vsub.f32 %v1582_v34, %v596_v33  ;;  %1205 = vmatprep.subr.bf16.mxu1 %v475_v44 }
 0x2ea   :  { %v598_v39 = vpop.xlane.xlu1 %597  ;;  %1206 = vmatpush3.bf16.msra.mxu1 %v475_v44 }
 0x2eb   :  { %v1621_v42 = vpop.eup %1318  ;;  %v643_v43 = vmul.f32 1.442695, %v617_v36  ;;  %v618_v22 = vsub.f32 %v1587_v40, %v598_v39  ;;  %1328 = vpow2.f32 %v641_v35 }
 0x2ec   :  { %663 = vadd.xlane.f32.xlu0 %v1621_v42  ;;  %v600_v28 = vpop.xlane.xlu0 %599  ;;  %661 = vadd.xlane.f32.xlu1 %v1619_v38 }
 0x2ed   :  { %1330 = vpow2.f32 %v643_v43  ;;  %v645_v34 = vmul.f32 1.442695, %v618_v22  ;;  %v619_v37 = vsub.f32 %v1596_v46, %v600_v28  ;;  %v1627_v50 = vpop.eup %1320  ;;  %v1303_v22 = vld [vmem:[#allocation7 + $0x8] sm:$0xff]  }
 0x2ee   :  { %v602_v51 = vpop.xlane.xlu1 %601 }
 0x2ef   :  { %v1629_v40 = vpop.eup %1322  ;;  %v647_v53 = vmul.f32 1.442695, %v619_v37  ;;  %v620_v54 = vsub.f32 %v1601_v48, %v602_v51  ;;  %1332 = vpow2.f32 %v645_v34 }
 0x2f0   :  { %667 = vadd.xlane.f32.xlu0 %v1629_v40  ;;  %v604_v55 = vpop.xlane.xlu0 %603  ;;  %665 = vadd.xlane.f32.xlu1 %v1627_v50 }
 0x2f1   :  { %1334 = vpow2.f32 %v647_v53  ;;  %v649_v46 = vmul.f32 1.442695, %v620_v54  ;;  %v621_v56 = vsub.f32 %v1594_v45, %v604_v55  ;;  %v1635_v57 = vpop.eup %1324 }
 0x2f2   :  { %v606_v58 = vpop.xlane.xlu1 %605 }
 0x2f3   :  { %v1637_v60 = vpop.eup %1326  ;;  %v651_v61 = vmul.f32 1.442695, %v621_v56  ;;  %v622_v48 = vsub.f32 %v1599_v47, %v606_v58  ;;  %1336 = vpow2.f32 %v649_v46  ;;  %v476_v47 = vpack.c.bf16 %v442_v3, %v439_v62 }
 0x2f4   :  { %671 = vadd.xlane.f32.xlu0 %v1637_v60  ;;  %669 = vadd.xlane.f32.xlu1 %v1635_v57 }
 0x2f5   :  { %1338 = vpow2.f32 %v651_v61  ;;  %v653_v45 = vmul.f32 1.442695, %v622_v48  ;;  %v1642_v1 = vpop.eup %1328  ;;  %1207 = vmatprep.subr.bf16.mxu1 %v476_v47 }
 0x2f6   :  { %1208 = vmatpush3.bf16.msra.mxu1 %v476_v47 }
 0x2f7   :  { %v1644_v2 = vpop.eup %1330  ;;  %1340 = vpow2.f32 %v653_v45  ;;  %1209 = vmatprep.subr.bf16.mxu1 %v477_v0  ;;  %v1307_v45 = vld [vmem:[#allocation7 + $0x28] sm:$0xff]  }
 0x2f8   :  { %675 = vadd.xlane.f32.xlu0 %v1644_v2  ;;  %673 = vadd.xlane.f32.xlu1 %v1642_v1 }
 0x2f9   :  { %v1648_v4 = vpop.eup %1332 }
 0x2fa   :  { %1210 = vmatpush3.bf16.msra.mxu1 %v477_v0 }
 0x2fb   :  { %v1650_v5 = vpop.eup %1334  ;;  %1227 = vmatprep.subr.bf16.mxu1 %v1302_v9 }
 0x2fc   :  { %679 = vadd.xlane.f32.xlu0 %v1650_v5  ;;  %677 = vadd.xlane.f32.xlu1 %v1648_v4 }
 0x2fd   :  { %v1654_v6 = vpop.eup %1336 }
 0x2ff   :  { %v1656_v7 = vpop.eup %1338 }
 0x300   :  { %683 = vadd.xlane.f32.xlu0 %v1656_v7  ;;  %681 = vadd.xlane.f32.xlu1 %v1654_v6 }
 0x301   :  { %v1660_v8 = vpop.eup %1340 }
 0x304   :  { %685 = vadd.xlane.f32.xlu1 %v1660_v8 }
 0x371   :  { %v656_v10 = vpop.xlane.xlu0 %655 }
 0x372   :  { %1342 = vrcp.f32 %v656_v10  ;;  %v1308_v10 = vld [vmem:[#allocation7 + $0x30] sm:$0xff]  }
 0x375   :  { %v660_v11 = vpop.xlane.xlu0 %659  ;;  %v658_v12 = vpop.xlane.xlu1 %657 }
 0x376   :  { %1344 = vrcp.f32 %v658_v12  ;;  %v1309_v12 = vld [vmem:[#allocation7 + $0x38] sm:$0xff]  }
 0x377   :  { %1346 = vrcp.f32 %v660_v11 }
 0x379   :  { %v664_v14 = vpop.xlane.xlu0 %663  ;;  %v662_v15 = vpop.xlane.xlu1 %661 }
 0x37a   :  { %1348 = vrcp.f32 %v662_v15 }
 0x37b   :  { %1350 = vrcp.f32 %v664_v14 }
 0x37c   :  { %v1343_v18 = vpop.eup %1342 }
 0x37d   :  { %v668_v16 = vpop.xlane.xlu0 %667  ;;  %v666_v17 = vpop.xlane.xlu1 %665  ;;  %v703_v23 = vmul.f32 %v1343_v18, %v1606_v13 }
 0x37e   :  { %1352 = vrcp.f32 %v666_v17 }
 0x37f   :  { %1354 = vrcp.f32 %v668_v16 }
 0x380   :  { %v1345_v19 = vpop.eup %1344 }
 0x381   :  { %v672_v20 = vpop.xlane.xlu0 %671  ;;  %v670_v21 = vpop.xlane.xlu1 %669  ;;  %v704_v26 = vmul.f32 %v1345_v19, %v1613_v29 }
 0x382   :  { %v1347_v27 = vpop.eup %1346  ;;  %1356 = vrcp.f32 %v670_v21 }
 0x383   :  { %v719_v30 = vpack.c.bf16 %v704_v26, %v703_v23  ;;  %1358 = vrcp.f32 %v672_v20  ;;  %v705_v36 = vmul.f32 %v1347_v27, %v1611_v24 }
 0x384   :  { %v1349_v32 = vpop.eup %1348 }
 0x385   :  { %v676_v33 = vpop.xlane.xlu0 %675  ;;  %v674_v35 = vpop.xlane.xlu1 %673  ;;  %v706_v39 = vmul.f32 %v1349_v32, %v1619_v38  ;;  %1211 = vmatprep.mubr.bf16.mxu1 %v719_v30  ;;  %v1304_v38 = vld [vmem:[#allocation7 + $0x10] sm:$0xff]  }
 0x386   :  { %v1351_v41 = vpop.eup %1350  ;;  %1360 = vrcp.f32 %v674_v35 }
 0x387   :  { %v720_v43 = vpack.c.bf16 %v706_v39, %v705_v36  ;;  %1362 = vrcp.f32 %v676_v33  ;;  %v707_v28 = vmul.f32 %v1351_v41, %v1621_v42 }
 0x388   :  { %v1353_v25 = vpop.eup %1352 }
 0x389   :  { %v680_v13 = vpop.xlane.xlu0 %679  ;;  %v678_v29 = vpop.xlane.xlu1 %677  ;;  %1212 = vmatmul.mubr.bf16.vlgmr.msra.gmra.mrb[16].mxu1 %v720_v43  ;;  %v708_v31 = vmul.f32 %v1353_v25, %v1627_v50  ;;  %v1305_v50 = vld [vmem:[#allocation7 + $0x18] sm:$0xff]   ;;  %v1058_v25 = vld [vmem:[%s1700_s3] ss:$0 sm:$0xff]  ;;  %s1478_s3 = smov [#allocation8]  }
 0x38a   :  { %v1355_v34 = vpop.eup %1354  ;;  %1364 = vrcp.f32 %v678_v29  ;;  %1228 = vmatpush3.bf16.msra.mxu1 %v1302_v9  ;;  %s1021_s30 = sshll.u32 %s1478_s3, 4  ;;  %s1022_s30 = int_to_ptr.vmem [resolvable:$true] %s1021_s30 }
 0x38b   :  { %v721_v24 = vpack.c.bf16 %v708_v31, %v707_v28  ;;  %1229 = vmatprep.subr.bf16.mxu1 %v1303_v22  ;;  %1366 = vrcp.f32 %v680_v13  ;;  %v709_v51 = vmul.f32 %v1355_v34, %v1629_v40  ;;  %s1440_s5 = scalar_lea.vmem %s1022_s30, 2048  ;;  %p1445_p11 = scmp.lt.s32.totalorder %s1022_s30, %s1022_s30 }
 0x38c   :  { %v1357_v37 = vpop.eup %1356  ;;  %p1441_p10 = scmp.ne.s32.totalorder %s1022_s30, %s1440_s5  ;;  %p1446_p12 = scmp.lt.s32.totalorder %s1440_s5, %s1440_s5 }
 0x38d   :  { %v684_v44 = vpop.xlane.xlu0 %683  ;;  %v682_v49 = vpop.xlane.xlu1 %681  ;;  %1215 = vmatprep.mubr.bf16.mxu1 %v721_v24  ;;  %v710_v52 = vmul.f32 %v1357_v37, %v1635_v57  ;;  %v1306_v57 = vld [vmem:[#allocation7 + $0x20] sm:$0xff]  }
 0x38e   :  { %v1359_v53 = vpop.eup %1358  ;;  %1368 = vrcp.f32 %v682_v49  ;;  %1230 = vmatpush3.bf16.msra.mxu1 %v1303_v22  ;;  %p1447_p13 = por %p1446_p12, %p1445_p11 }
 0x38f   :  { %1370 = vrcp.f32 %v684_v44  ;;  %v722_v42 = vpack.c.bf16 %v710_v52, %v709_v51  ;;  %1231 = vmatprep.subr.bf16.mxu1 %v1304_v38  ;;  %v711_v46 = vmul.f32 %v1359_v53, %v1637_v60 }
 0x390   :  { %v1361_v54 = vpop.eup %1360  ;;  %p1448_p0 = pnand %p1447_p13, %p1441_p10 }
 0x391   :  { %v686_v55 = vpop.xlane.xlu1 %685  ;;  %1216 = vmatmul.mubr.bf16.gmra.mrb[20].mxu1 %v722_v42  ;;  %v712_v56 = vmul.f32 %v1361_v54, %v1642_v1  ;;  %v1363_v58 = vpop.eup %1362 }
 0x392   :  { %1372 = vrcp.f32 %v686_v55  ;;  %1232 = vmatpush3.bf16.msra.mxu1 %v1304_v38  ;;  %v713_v61 = vmul.f32 %v1363_v58, %v1644_v2 }
 0x393   :  { %v723_v40 = vpack.c.bf16 %v712_v56, %v711_v46  ;;  %1233 = vmatprep.subr.bf16.mxu1 %v1305_v50 }
 0x394   :  { %v1365_v59 = vpop.eup %1364 }
 0x395   :  { %1219 = vmatprep.mubr.bf16.mxu1 %v723_v40  ;;  %v714_v48 = vmul.f32 %v1365_v59, %v1648_v4  ;;  %v1367_v62 = vpop.eup %1366 }
 0x396   :  { %1234 = vmatpush3.bf16.msra.mxu1 %v1305_v50  ;;  %v715_v1 = vmul.f32 %v1367_v62, %v1650_v5 }
 0x397   :  { %v724_v63 = vpack.c.bf16 %v714_v48, %v713_v61  ;;  %1235 = vmatprep.subr.bf16.mxu1 %v1306_v57 }
 0x398   :  { %v1369_v0 = vpop.eup %1368 }
 0x399   :  { %v1371_v60 = vpop.eup %1370  ;;  %1220 = vmatmul.mubr.bf16.gmra.mrb[24].mxu1 %v724_v63  ;;  %v716_v3 = vmul.f32 %v1369_v0, %v1654_v6 }
 0x39a   :  { %1236 = vmatpush3.bf16.msra.mxu1 %v1306_v57  ;;  %v717_v2 = vmul.f32 %v1371_v60, %v1656_v7 }
 0x39b   :  { %v725_v9 = vpack.c.bf16 %v716_v3, %v715_v1  ;;  %1237 = vmatprep.subr.bf16.mxu1 %v1307_v45 }
 0x39c   :  { %v1373_v47 = vpop.eup %1372 }
 0x39d   :  { %v718_v4 = vmul.f32 %v1373_v47, %v1660_v8  ;;  %1223 = vmatprep.mubr.bf16.mxu1 %v725_v9 }
 0x39e   :  { %1238 = vmatpush3.bf16.msra.mxu1 %v1307_v45 }
 0x39f   :  { %v726_v11 = vpack.c.bf16 %v718_v4, %v717_v2  ;;  %1239 = vmatprep.subr.bf16.mxu1 %v1308_v10 }
 0x3a1   :  { %1224 = vmatmul.mubr.bf16.gmra.mrb[28].mxu1 %v726_v11 }
 0x3a2   :  { %1240 = vmatpush3.bf16.msra.mxu1 %v1308_v10 }
 0x3a3   :  { %1241 = vmatprep.subr.bf16.mxu1 %v1309_v12 }
 0x3a6   :  { %1242 = vmatpush3.bf16.msra.mxu1 %v1309_v12 }
 0x45c   :  { %v1213_v5 = vpop.f32.mrb[16].mxu1 }
 0x45d   :  { %v761_v6 = vpop.f32.mrb[17].mxu1 }
 0x45e   :  { %v1214_v14 = vpop.f32.mrb[18].mxu1 }
 0x45f   :  { %v825_v15 = vpack.c.bf16 %v1214_v14, %v1213_v5  ;;  %v764_v16 = vpop.f32.mrb[19].mxu1 }
 0x460   :  { %v824_v17 = vpack.c.bf16 %v764_v16, %v761_v6 }
 0x462   :  { %1243 = vmatprep.mubr.bf16.mxu1 %v824_v17 }
 0x463   :  { %1244 = vmatmul.mubr.bf16.vlgmr.msra.gmra.mrb[32].mxu1 %v825_v15 }
 0x464   :  { %v1217_v7 = vpop.f32.mrb[20].mxu1 }
 0x465   :  { %v777_v18 = vpop.f32.mrb[21].mxu1 }
 0x466   :  { %v1218_v8 = vpop.f32.mrb[22].mxu1 }
 0x467   :  { %v827_v19 = vpack.c.bf16 %v1218_v8, %v1217_v7  ;;  %v780_v20 = vpop.f32.mrb[23].mxu1 }
 0x468   :  { %v826_v21 = vpack.c.bf16 %v780_v20, %v777_v18 }
 0x46a   :  { %1247 = vmatprep.mubr.bf16.mxu1 %v826_v21 }
 0x46b   :  { %1248 = vmatmul.mubr.bf16.gmra.mrb[36].mxu1 %v827_v19 }
 0x46c   :  { %v1221_v23 = vpop.f32.mrb[24].mxu1 }
 0x46d   :  { %v793_v26 = vpop.f32.mrb[25].mxu1 }
 0x46e   :  { %v1222_v27 = vpop.f32.mrb[26].mxu1 }
 0x46f   :  { %v829_v30 = vpack.c.bf16 %v1222_v27, %v1221_v23  ;;  %v796_v32 = vpop.f32.mrb[27].mxu1 }
 0x470   :  { %v828_v33 = vpack.c.bf16 %v796_v32, %v793_v26 }
 0x472   :  { %1251 = vmatprep.mubr.bf16.mxu1 %v828_v33 }
 0x473   :  { %1252 = vmatmul.mubr.bf16.gmra.mrb[40].mxu1 %v829_v30 }
 0x474   :  { %v1225_v35 = vpop.f32.mrb[28].mxu1 }
 0x475   :  { %v809_v36 = vpop.f32.mrb[29].mxu1 }
 0x476   :  { %v1226_v39 = vpop.f32.mrb[30].mxu1 }
 0x477   :  { %v831_v41 = vpack.c.bf16 %v1226_v39, %v1225_v35  ;;  %v812_v43 = vpop.f32.mrb[31].mxu1 }
 0x478   :  { %v830_v22 = vpack.c.bf16 %v812_v43, %v809_v36 }
 0x47a   :  { %1255 = vmatprep.mubr.bf16.mxu1 %v830_v22 }
 0x47b   :  { %1256 = vmatmul.mubr.bf16.gmra.mrb[44].mxu1 %v831_v41 }
 0x536   :  { %v1245_v13 = vpop.f32.mrb[32].mxu1 }
 0x537   :  { %v946_v29 = vadd.f32 %v1245_v13, %v1058_v25  ;;  %v937_v28 = vpop.f32.mrb[33].mxu1 }
 0x538   :  { %v938_v31 = vadd.f32 %v1058_v25, %v937_v28  ;;  %v1246_v34 = vpop.f32.mrb[34].mxu1 }
 0x539   :  { %1002 = vst [vmem:[#allocation8 + $0x10] sm:$0xff] %v946_v29  ;;  %v949_v24 = vadd.f32 %v1246_v34, %v1058_v25  ;;  %v940_v38 = vpop.f32.mrb[35].mxu1 }
 0x53a   :  { %1000 = vst [vmem:[#allocation8] sm:$0xff] %v938_v31  ;;  %v941_v37 = vadd.f32 %v1058_v25, %v940_v38 }
 0x53b   :  { %1003 = vst [vmem:[#allocation8 + $0x18] sm:$0xff] %v949_v24 }
 0x53c   :  { %1001 = vst [vmem:[#allocation8 + $0x8] sm:$0xff] %v941_v37 }
 0x53e   :  { %v1249_v44 = vpop.f32.mrb[36].mxu1 }
 0x53f   :  { %v962_v49 = vadd.f32 %v1249_v44, %v1058_v25  ;;  %v953_v51 = vpop.f32.mrb[37].mxu1 }
 0x540   :  { %v954_v52 = vadd.f32 %v1058_v25, %v953_v51  ;;  %v1250_v53 = vpop.f32.mrb[38].mxu1 }
 0x541   :  { %1006 = vst [vmem:[#allocation8 + $0x30] sm:$0xff] %v962_v49  ;;  %v965_v42 = vadd.f32 %v1250_v53, %v1058_v25  ;;  %v956_v50 = vpop.f32.mrb[39].mxu1 }
 0x542   :  { %1004 = vst [vmem:[#allocation8 + $0x20] sm:$0xff] %v954_v52  ;;  %v957_v54 = vadd.f32 %v1058_v25, %v956_v50 }
 0x543   :  { %1007 = vst [vmem:[#allocation8 + $0x38] sm:$0xff] %v965_v42 }
 0x544   :  { %1005 = vst [vmem:[#allocation8 + $0x28] sm:$0xff] %v957_v54 }
 0x546   :  { %v1253_v55 = vpop.f32.mrb[40].mxu1 }
 0x547   :  { %v978_v46 = vadd.f32 %v1253_v55, %v1058_v25  ;;  %v969_v56 = vpop.f32.mrb[41].mxu1 }
 0x548   :  { %v970_v58 = vadd.f32 %v1058_v25, %v969_v56  ;;  %v1254_v40 = vpop.f32.mrb[42].mxu1 }
 0x549   :  { %1010 = vst [vmem:[#allocation8 + $0x50] sm:$0xff] %v978_v46  ;;  %v981_v57 = vadd.f32 %v1254_v40, %v1058_v25  ;;  %v972_v59 = vpop.f32.mrb[43].mxu1 }
 0x54a   :  { %1008 = vst [vmem:[#allocation8 + $0x40] sm:$0xff] %v970_v58  ;;  %v973_v61 = vadd.f32 %v1058_v25, %v972_v59 }
 0x54b   :  { %1011 = vst [vmem:[#allocation8 + $0x58] sm:$0xff] %v981_v57 }
 0x54c   :  { %1009 = vst [vmem:[#allocation8 + $0x48] sm:$0xff] %v973_v61 }
 0x54e   :  { %v1257_v48 = vpop.f32.mrb[44].mxu1 }
 0x54f   :  { %v994_v62 = vadd.f32 %v1257_v48, %v1058_v25  ;;  %v985_v63 = vpop.f32.mrb[45].mxu1 }
 0x550   :  { %v986_v45 = vadd.f32 %v1058_v25, %v985_v63  ;;  %v1258_v0 = vpop.f32.mrb[46].mxu1 }
 0x551   :  { %1014 = vst [vmem:[#allocation8 + $0x70] sm:$0xff] %v994_v62  ;;  %v997_v60 = vadd.f32 %v1258_v0, %v1058_v25  ;;  %v988_v1 = vpop.f32.mrb[47].mxu1 }
 0x552   :  { %1012 = vst [vmem:[#allocation8 + $0x60] sm:$0xff] %v986_v45  ;;  %v989_v3 = vadd.f32 %v1058_v25, %v988_v1 }
 0x553   :  { %1015 = vst [vmem:[#allocation8 + $0x78] sm:$0xff] %v997_v60 }
 0x554   :  { %1013 = vst [vmem:[#allocation8 + $0x68] sm:$0xff] %v989_v3 }
 0x555   :  { %1451 = shalt.err (!%p1448_p0)
}
 0x556   :  { %s1452_s8 = scalar_lea.hbm %s1701_s4, 2048 }
 0x557   :  { %p1453_p1 = scmp.ne.s32.totalorder %s1701_s4, %s1452_s8  ;;  %p1456_p2 = scmp.lt.u32.totalorder %s1452_s8, %s1701_s4 }
 0x559   :  { %p1458_p3 = pnand %p1456_p2, %p1453_p1 }
 0x55b   :  { %1461 = shalt.err (!%p1458_p3)
}
 0x55c   :  { %1027 = dma.vmem_to_hbm [thread:$0]  %s1022_s30, 2048, %s1701_s4, [#allocation4], %s1472_s1, %s1472_s1, %s1473_s13  }
 0x55d   :  { %1466 = dma.done.wait [#allocation4], 2048  }
 0x55e   :  { %1467 = vsyncadd [#allocation4], 4294965248 }
 0x55f   :  { %1031 = vsyncpa [#allocation3], 1 }
 0x560   :  { %1032 = vsyncpa [#allocation6], 1 }
 0x561   :  { %1033 = vsyncpa [#allocation4], 1 }

</bundles_post_ra>
